<compile_context>
chip_gen: v7x
topology: tpu7x:2x2x1
jax: 0.10.0
libtpu: 0.0.40
codegen_flags: <defaults>
</compile_context>

<pallas_src>
import functools

import jax
import jax.numpy as jnp
import numpy as np
from jax import lax
from jax.experimental import pallas as pl
from jax.experimental.pallas import tpu as pltpu


def _kmeans_loss_kernel(z_ref, mu_ref, mask_ref, out_ref,
                        zm_acc, zzm_acc, csum_acc,
                        *, n, k, tile_n, n_split, needs_row_mask):
    c = pl.program_id(0)            # parallel (core-split) axis
    j = pl.program_id(1)            # reduction axis over n-tiles
    num_j = pl.num_programs(1)

    @pl.when(j == 0)
    def _():
        zm_acc[...] = jnp.zeros_like(zm_acc)
        zzm_acc[...] = jnp.zeros_like(zzm_acc)
        csum_acc[...] = jnp.zeros_like(csum_acc)

    z = z_ref[...]                                       # (tile_n, d) f32/bf16
    mask_f = mask_ref[...].astype(jnp.float32)           # (tile_n, k)

    if needs_row_mask:
        # Zero rows whose global index >= n (ragged last tile / phantom tiles
        # of the 2-way split). z itself must be zeroed -- not masked after the
        # fact -- so garbage in the partially-filled block can never poison the
        # squares or the MXU (0 * NaN = NaN).
        row0 = (c * num_j + j) * tile_n
        rows = lax.broadcasted_iota(jnp.int32, (tile_n, 1), 0) + row0
        valid = rows < n
        z = jnp.where(valid, z, jnp.zeros_like(z))
        mask_f = jnp.where(valid, mask_f, jnp.zeros_like(mask_f))

    zf = z.astype(jnp.float32)
    zz = zf * zf                                         # (tile_n, d)

    mask_mm = mask_f.astype(z.dtype)                     # 0/1 exact in bf16 too
    # Contract over the n-tile on the MXU; outputs are (k, d) accumulators.
    zm_acc[...] += lax.dot_general(
        mask_mm, z, (((0,), (0,)), ((), ())),
        preferred_element_type=jnp.float32)              # (k, d)
    zzm_acc[...] += lax.dot_general(
        mask_f, zz, (((0,), (0,)), ((), ())),
        preferred_element_type=jnp.float32)              # (k, d)
    csum_acc[...] += jnp.sum(mask_f, axis=0, keepdims=True)      # (1, k)

    @pl.when(j == num_j - 1)
    def _():
        mu = mu_ref[...].astype(jnp.float32)                     # (k, d)
        mu_sq = jnp.sum(mu * mu, axis=-1, keepdims=True)         # (k, 1)

        # intra partial:  sum_ij m_ij (||z_i||^2 + ||mu_j||^2 - 2 z_i.mu_j)
        term_zz = jnp.sum(zzm_acc[...], keepdims=True)           # (1, 1)
        term_mu = lax.dot_general(
            csum_acc[...], mu_sq, (((1,), (0,)), ((), ())),
            preferred_element_type=jnp.float32)                  # (1, 1)
        term_x = jnp.sum(zm_acc[...] * mu, keepdims=True)        # (1, 1)
        intra_sum = term_zz + term_mu - 2.0 * term_x

        # inter closed form: sum_ij ||mu_i - mu_j||^2
        #   = 2k * sum_i ||mu_i||^2 - 2 * ||sum_i mu_i||^2
        mu_tot = jnp.sum(mu, axis=0, keepdims=True)              # (1, d)
        inter_sum = (2.0 * float(k)) * jnp.sum(mu_sq, keepdims=True) \
            - 2.0 * jnp.sum(mu_tot * mu_tot, keepdims=True)      # (1, 1)

        # Each core emits its intra partial plus its 1/n_split share of inter.
        out_ref[...] = (intra_sum * (1.0 / float(n * k))
                        - inter_sum * (1.0 / float(k * k * n_split))
                        ).astype(out_ref.dtype)


def _vmem_budget_bytes():
    cap = 64 * 1024 * 1024          # conservative fallback = v7x physical VMEM
    try:
        info = pltpu.get_tpu_info()
        cap = int(getattr(info, "vmem_capacity_bytes", cap)) or cap
    except Exception:
        pass
    return (3 * cap) // 4           # ~96 MiB on v5e/v6e, ~48 MiB on v7x


def _pick_tile_n(d, k, z_itemsize, mu_itemsize, vmem_budget):
    per_row = 2 * (d * z_itemsize + k)          # double-buffered z + int8 mask
    fixed = 2 * k * d * mu_itemsize             # resident centroids (2-buf worst case)
    fixed += (2 * max(k, 8) + 8) * d * 4        # zm / zzm accumulators (padded)
    fixed += 8 * 128 * 4 + (1 << 20)            # csum acc + output + slack
    avail = vmem_budget - fixed
    if avail <= 0:
        return 256  # TODO(synk): tile d as well for extremely large hidden sizes
    t = int(avail // per_row)
    t = max(256, min(t, 4096))
    return (t // 256) * 256


def kmeans_clustering_loss(encode_output, centroids, mask_matrix, *,
                           tile_n=None, n_split=None):
    """encode_output: (n, d), centroids: (k, d), mask_matrix: (n, k) bool."""
    n, d = encode_output.shape
    k, d2 = centroids.shape
    assert d == d2, "Dimensions Mismatch"

    float_ok = (jnp.float32, jnp.bfloat16)
    z = (encode_output if encode_output.dtype in float_ok
         else encode_output.astype(jnp.float32))
    mu = centroids if centroids.dtype in float_ok else centroids.astype(jnp.float32)
    mask = mask_matrix.astype(jnp.int8)          # 1 byte/elem HBM traffic

    vmem_budget = _vmem_budget_bytes()
    if tile_n is None:
        tile_n = _pick_tile_n(d, k, z.dtype.itemsize, mu.dtype.itemsize,
                              vmem_budget)
    if n <= tile_n:
        tile_n = n                               # single full-extent block
    total_tiles = pl.cdiv(n, tile_n)
    if n_split is None:
        # Split the reduction across v7x's two TensorCores; harmless (serial)
        # on single-core chips.
        n_split = 2 if total_tiles >= 2 else 1
    tiles_per_split = pl.cdiv(total_tiles, n_split)
    last_block = total_tiles - 1
    needs_row_mask = (n_split * tiles_per_split * tile_n) != n

    def n_block_map(c, j):
        # Phantom tiles (odd tile counts) are clamped onto the last real block;
        # their rows are zeroed in-kernel via the row-validity mask.
        return (jnp.minimum(c * tiles_per_split + j, last_block), 0)

    kernel = functools.partial(
        _kmeans_loss_kernel, n=n, k=k, tile_n=tile_n, n_split=n_split,
        needs_row_mask=needs_row_mask)

    out = pl.pallas_call(
        kernel,
        out_shape=jax.ShapeDtypeStruct((n_split, 1), jnp.float32),
        grid_spec=pltpu.PrefetchScalarGridSpec(
            num_scalar_prefetch=0,
            grid=(n_split, tiles_per_split),
            in_specs=[
                pl.BlockSpec((tile_n, d), n_block_map),           # z tile
                pl.BlockSpec((k, d), lambda c, j: (0, 0)),        # mu, resident
                pl.BlockSpec((tile_n, k), n_block_map),           # mask tile (int8)
            ],
            out_specs=pl.BlockSpec((1, 1), lambda c, j: (c, 0)),
            scratch_shapes=[
                pltpu.VMEM((k, d), jnp.float32),                  # zm  = mask^T @ z
                pltpu.VMEM((k, d), jnp.float32),                  # zzm = mask^T @ z^2
                pltpu.VMEM((1, k), jnp.float32),                  # column sums of mask
            ],
        ),
        compiler_params=pltpu.CompilerParams(
            dimension_semantics=("parallel", "arbitrary"),
            vmem_limit_bytes=int(vmem_budget),
        ),
    )(z, mu, mask)

    # Each per-core partial already carries 1/n_split of the inter term.
    return jnp.sum(out)


def reference_loss(encode_output, centroids, mask_matrix):
    # Pure-JAX mirror of the PyTorch module, for verification.
    n, d = encode_output.shape
    k = centroids.shape[0]
    z = jnp.broadcast_to(encode_output[:, None, :], (n, k, d))
    mu = jnp.broadcast_to(centroids[None, :, :], (n, k, d))
    neg = ~mask_matrix
    z = jnp.where(neg[:, :, None], 0.0, z)
    mu = jnp.where(neg[:, :, None], 0.0, mu)
    intra = jnp.mean(jnp.sum((z - mu) ** 2, axis=-1))
    mu1 = jnp.broadcast_to(centroids[None, :, :], (k, k, d))
    mu2 = jnp.broadcast_to(centroids[:, None, :], (k, k, d))
    inter = jnp.mean(jnp.sum((mu1 - mu2) ** 2, axis=-1))
    return intra - inter


if __name__ == "__main__":
    key = jax.random.PRNGKey(0)

    # --- Case 1: tiny shapes matching the module's forward (single tile). ----
    n, d, k = 8, 32, 4
    kz, km, ka = jax.random.split(jax.random.fold_in(key, 1), 3)
    encode_output = jax.random.normal(kz, (n, d), dtype=jnp.float32)
    centroids = jax.random.normal(km, (k, d), dtype=jnp.float32)
    assign = jax.random.randint(ka, (n,), 0, k)
    mask_matrix = assign[:, None] == jnp.arange(k)[None, :]      # (n, k) bool

    loss = kmeans_clustering_loss(encode_output, centroids, mask_matrix)
    jax.block_until_ready(loss)
    ref = reference_loss(encode_output, centroids, mask_matrix)
    np.testing.assert_allclose(np.asarray(loss), np.asarray(ref),
                               rtol=1e-4, atol=1e-4)

    # --- Case 2: multi-tile grid, ragged last tile, 2-way core split. --------
    n2, d2, k2 = 1000, 32, 4
    kz2, km2, ka2 = jax.random.split(jax.random.fold_in(key, 2), 3)
    z2 = jax.random.normal(kz2, (n2, d2), dtype=jnp.float32)
    c2 = jax.random.normal(km2, (k2, d2), dtype=jnp.float32)
    assign2 = jax.random.randint(ka2, (n2,), 0, k2)
    m2 = assign2[:, None] == jnp.arange(k2)[None, :]             # (n2, k2) bool

    loss2 = kmeans_clustering_loss(z2, c2, m2, tile_n=256)       # forces 4 tiles
    jax.block_until_ready(loss2)
    ref2 = reference_loss(z2, c2, m2)
    np.testing.assert_allclose(np.asarray(loss2), np.asarray(ref2),
                               rtol=1e-4, atol=1e-4)

    print("KERNEL_OK")
</pallas_src>

<mosaic_0001>
module attributes {stable_mosaic.version = 11 : i64} {
  func.func @_kmeans_loss_kernel(%arg0: i32, %arg1: i32, %arg2: memref<8x32xf32, #tpu.memory_space<vmem>>, %arg3: memref<4x32xf32, #tpu.memory_space<vmem>>, %arg4: memref<8x4xi8, #tpu.memory_space<vmem>>, %arg5: memref<1x1xf32, #tpu.memory_space<vmem>>, %arg6: memref<4x32xf32, #tpu.memory_space<vmem>>, %arg7: memref<4x32xf32, #tpu.memory_space<vmem>>, %arg8: memref<1x4xf32, #tpu.memory_space<vmem>>) attributes {dimension_semantics = [#tpu.dimension_semantics<parallel>, #tpu.dimension_semantics<arbitrary>], iteration_bounds = array<i64: 1, 1>, scalar_prefetch = 0 : i64, scratch_operands = 3 : i64, tpu.core_type = #tpu.core_type<tc>, window_params = [{transform_indices = @transform_0, window_bounds = array<i64: 8, 32>}, {pipeline_mode = #tpu.pipeline_mode<synchronous>, transform_indices = @transform_1, window_bounds = array<i64: 4, 32>}, {transform_indices = @transform_2, window_bounds = array<i64: 8, 4>}, {transform_indices = @transform_3, window_bounds = array<i64: 1, 1>}]} {
    %c0_i32 = arith.constant 0 : i32
    %0 = arith.cmpi eq, %arg1, %c0_i32 : i32
    %1 = arith.extui %0 : i1 to i32
    %c0_i32_0 = arith.constant 0 : i32
    %2 = arith.cmpi ne, %1, %c0_i32_0 : i32
    scf.if %2 {
      %cst_20 = arith.constant 0.000000e+00 : f32
      %23 = vector.broadcast %cst_20 : f32 to vector<4x32xf32>
      %c0_21 = arith.constant 0 : index
      %c0_22 = arith.constant 0 : index
      %24 = vector.load %arg6[%c0_21, %c0_22] : memref<4x32xf32, #tpu.memory_space<vmem>>, vector<4x32xf32>
      tpu.vector_store %arg6[%c0_21, %c0_22], %23 {strides = array<i32>} : memref<4x32xf32, #tpu.memory_space<vmem>>, vector<4x32xf32>,
      %cst_23 = arith.constant 0.000000e+00 : f32
      %25 = vector.broadcast %cst_23 : f32 to vector<4x32xf32>
      %c0_24 = arith.constant 0 : index
      %c0_25 = arith.constant 0 : index
      %26 = vector.load %arg7[%c0_24, %c0_25] : memref<4x32xf32, #tpu.memory_space<vmem>>, vector<4x32xf32>
      tpu.vector_store %arg7[%c0_24, %c0_25], %25 {strides = array<i32>} : memref<4x32xf32, #tpu.memory_space<vmem>>, vector<4x32xf32>,
      %cst_26 = arith.constant 0.000000e+00 : f32
      %27 = vector.broadcast %cst_26 : f32 to vector<1x4xf32>
      %c0_27 = arith.constant 0 : index
      %c0_28 = arith.constant 0 : index
      %28 = vector.load %arg8[%c0_27, %c0_28] : memref<1x4xf32, #tpu.memory_space<vmem>>, vector<1x4xf32>
      tpu.vector_store %arg8[%c0_27, %c0_28], %27 {strides = array<i32>} : memref<1x4xf32, #tpu.memory_space<vmem>>, vector<1x4xf32>,
    } else {
    }
    %c0 = arith.constant 0 : index
    %c0_1 = arith.constant 0 : index
    %3 = vector.load %arg2[%c0, %c0_1] : memref<8x32xf32, #tpu.memory_space<vmem>>, vector<8x32xf32>
    %c0_2 = arith.constant 0 : index
    %c0_3 = arith.constant 0 : index
    %4 = vector.load %arg4[%c0_2, %c0_3] : memref<8x4xi8, #tpu.memory_space<vmem>>, vector<8x4xi8>
    %5 = arith.sitofp %4 : vector<8x4xi8> to vector<8x4xf32>
    %6 = arith.mulf %3, %3 : vector<8x32xf32>
    %c0_4 = arith.constant 0 : index
    %c0_5 = arith.constant 0 : index
    %7 = vector.load %arg6[%c0_4, %c0_5] : memref<4x32xf32, #tpu.memory_space<vmem>>, vector<4x32xf32>
    %cst = arith.constant dense<0.000000e+00> : vector<4x32xf32>
    %8 = tpu.matmul %5, %3, %cst {dimension_numbers = #tpu.dot_dimension_numbers<[0], [0], [1], [1], [0, 1, 1, 1], [], []>} : vector<8x4xf32>, vector<8x32xf32>, vector<4x32xf32> -> vector<4x32xf32>
    %9 = arith.addf %7, %8 : vector<4x32xf32>
    %c0_6 = arith.constant 0 : index
    %c0_7 = arith.constant 0 : index
    %10 = vector.load %arg6[%c0_6, %c0_7] : memref<4x32xf32, #tpu.memory_space<vmem>>, vector<4x32xf32>
    tpu.vector_store %arg6[%c0_6, %c0_7], %9 {strides = array<i32>} : memref<4x32xf32, #tpu.memory_space<vmem>>, vector<4x32xf32>,
    %c0_8 = arith.constant 0 : index
    %c0_9 = arith.constant 0 : index
    %11 = vector.load %arg7[%c0_8, %c0_9] : memref<4x32xf32, #tpu.memory_space<vmem>>, vector<4x32xf32>
    %cst_10 = arith.constant dense<0.000000e+00> : vector<4x32xf32>
    %12 = tpu.matmul %5, %6, %cst_10 {dimension_numbers = #tpu.dot_dimension_numbers<[0], [0], [1], [1], [0, 1, 1, 1], [], []>} : vector<8x4xf32>, vector<8x32xf32>, vector<4x32xf32> -> vector<4x32xf32>
    %13 = arith.addf %11, %12 : vector<4x32xf32>
    %c0_11 = arith.constant 0 : index
    %c0_12 = arith.constant 0 : index
    %14 = vector.load %arg7[%c0_11, %c0_12] : memref<4x32xf32, #tpu.memory_space<vmem>>, vector<4x32xf32>
    tpu.vector_store %arg7[%c0_11, %c0_12], %13 {strides = array<i32>} : memref<4x32xf32, #tpu.memory_space<vmem>>, vector<4x32xf32>,
    %c0_13 = arith.constant 0 : index
    %c0_14 = arith.constant 0 : index
    %15 = vector.load %arg8[%c0_13, %c0_14] : memref<1x4xf32, #tpu.memory_space<vmem>>, vector<1x4xf32>
    %cst_15 = arith.constant dense<0.000000e+00> : vector<4xf32>
    %16 = vector.multi_reduction <add>, %5, %cst_15 [0] : vector<8x4xf32> to vector<4xf32>
    %17 = vector.shape_cast %16 : vector<4xf32> to vector<1x4xf32>
    %18 = arith.addf %15, %17 : vector<1x4xf32>
    %c0_16 = arith.constant 0 : index
    %c0_17 = arith.constant 0 : index
    %19 = vector.load %arg8[%c0_16, %c0_17] : memref<1x4xf32, #tpu.memory_space<vmem>>, vector<1x4xf32>
    tpu.vector_store %arg8[%c0_16, %c0_17], %18 {strides = array<i32>} : memref<1x4xf32, #tpu.memory_space<vmem>>, vector<1x4xf32>,
    %c0_i32_18 = arith.constant 0 : i32
    %20 = arith.cmpi eq, %arg1, %c0_i32_18 : i32
    %21 = arith.extui %20 : i1 to i32
    %c0_i32_19 = arith.constant 0 : i32
    %22 = arith.cmpi ne, %21, %c0_i32_19 : i32
    scf.if %22 {
      %c0_20 = arith.constant 0 : index
      %c0_21 = arith.constant 0 : index
      %23 = vector.load %arg3[%c0_20, %c0_21] : memref<4x32xf32, #tpu.memory_space<vmem>>, vector<4x32xf32>
      %24 = arith.mulf %23, %23 : vector<4x32xf32>
      %cst_22 = arith.constant dense<0.000000e+00> : vector<4xf32>
      %25 = vector.multi_reduction <add>, %24, %cst_22 [1] : vector<4x32xf32> to vector<4xf32>
      %26 = vector.shape_cast %25 : vector<4xf32> to vector<4x1xf32>
      %c0_23 = arith.constant 0 : index
      %c0_24 = arith.constant 0 : index
      %27 = vector.load %arg7[%c0_23, %c0_24] : memref<4x32xf32, #tpu.memory_space<vmem>>, vector<4x32xf32>
      %28 = vector.shape_cast %27 : vector<4x32xf32> to vector<1x4x32xf32>
      %cst_25 = arith.constant dense<0.000000e+00> : vector<1xf32>
      %29 = vector.multi_reduction <add>, %28, %cst_25 [1, 2] : vector<1x4x32xf32> to vector<1xf32>
      %30 = vector.shape_cast %29 : vector<1xf32> to vector<1x1x1xf32>
      %31 = vector.extract %30[0, 0, 0] : f32 from vector<1x1x1xf32>
      %32 = vector.broadcast %31 : f32 to vector<1x1xf32>
      %c0_26 = arith.constant 0 : index
      %c0_27 = arith.constant 0 : index
      %33 = vector.load %arg8[%c0_26, %c0_27] : memref<1x4xf32, #tpu.memory_space<vmem>>, vector<1x4xf32>
      %cst_28 = arith.constant dense<0.000000e+00> : vector<1x1xf32>
      %34 = tpu.matmul %33, %26, %cst_28 {dimension_numbers = #tpu.dot_dimension_numbers<[1], [0], [0], [1], [0, 0, 1, 1], [], []>} : vector<1x4xf32>, vector<4x1xf32>, vector<1x1xf32> -> vector<1x1xf32>
      %c0_29 = arith.constant 0 : index
      %c0_30 = arith.constant 0 : index
      %35 = vector.load %arg6[%c0_29, %c0_30] : memref<4x32xf32, #tpu.memory_space<vmem>>, vector<4x32xf32>
      %36 = arith.mulf %35, %23 : vector<4x32xf32>
      %37 = vector.shape_cast %36 : vector<4x32xf32> to vector<1x4x32xf32>
      %cst_31 = arith.constant dense<0.000000e+00> : vector<1xf32>
      %38 = vector.multi_reduction <add>, %37, %cst_31 [1, 2] : vector<1x4x32xf32> to vector<1xf32>
      %39 = vector.shape_cast %38 : vector<1xf32> to vector<1x1x1xf32>
      %40 = vector.extract %39[0, 0, 0] : f32 from vector<1x1x1xf32>
      %41 = vector.broadcast %40 : f32 to vector<1x1xf32>
      %42 = arith.addf %32, %34 : vector<1x1xf32>
      %cst_32 = arith.constant 2.000000e+00 : f32
      %43 = vector.broadcast %cst_32 : f32 to vector<1x1xf32>
      %44 = arith.mulf %43, %41 : vector<1x1xf32>
      %45 = arith.subf %42, %44 : vector<1x1xf32>
      %cst_33 = arith.constant dense<0.000000e+00> : vector<32xf32>
      %46 = vector.multi_reduction <add>, %23, %cst_33 [0] : vector<4x32xf32> to vector<32xf32>
      %47 = vector.shape_cast %46 : vector<32xf32> to vector<1x32xf32>
      %48 = vector.shape_cast %26 : vector<4x1xf32> to vector<1x4x1xf32>
      %cst_34 = arith.constant dense<0.000000e+00> : vector<1xf32>
      %49 = vector.multi_reduction <add>, %48, %cst_34 [1, 2] : vector<1x4x1xf32> to vector<1xf32>
      %50 = vector.shape_cast %49 : vector<1xf32> to vector<1x1x1xf32>
      %51 = vector.extract %50[0, 0, 0] : f32 from vector<1x1x1xf32>
      %52 = vector.broadcast %51 : f32 to vector<1x1xf32>
      %cst_35 = arith.constant 8.000000e+00 : f32
      %53 = vector.broadcast %cst_35 : f32 to vector<1x1xf32>
      %54 = arith.mulf %53, %52 : vector<1x1xf32>
      %55 = arith.mulf %47, %47 : vector<1x32xf32>
      %56 = vector.shape_cast %55 : vector<1x32xf32> to vector<1x1x32xf32>
      %cst_36 = arith.constant dense<0.000000e+00> : vector<1xf32>
      %57 = vector.multi_reduction <add>, %56, %cst_36 [1, 2] : vector<1x1x32xf32> to vector<1xf32>
      %58 = vector.shape_cast %57 : vector<1xf32> to vector<1x1x1xf32>
      %59 = vector.extract %58[0, 0, 0] : f32 from vector<1x1x1xf32>
      %60 = vector.broadcast %59 : f32 to vector<1x1xf32>
      %cst_37 = arith.constant 2.000000e+00 : f32
      %61 = vector.broadcast %cst_37 : f32 to vector<1x1xf32>
      %62 = arith.mulf %61, %60 : vector<1x1xf32>
      %63 = arith.subf %54, %62 : vector<1x1xf32>
      %cst_38 = arith.constant 3.125000e-02 : f32
      %64 = vector.broadcast %cst_38 : f32 to vector<1x1xf32>
      %65 = arith.mulf %45, %64 : vector<1x1xf32>
      %cst_39 = arith.constant 6.250000e-02 : f32
      %66 = vector.broadcast %cst_39 : f32 to vector<1x1xf32>
      %67 = arith.mulf %63, %66 : vector<1x1xf32>
      %68 = arith.subf %65, %67 : vector<1x1xf32>
      %c0_40 = arith.constant 0 : index
      %c0_41 = arith.constant 0 : index
      %69 = vector.load %arg5[%c0_40, %c0_41] : memref<1x1xf32, #tpu.memory_space<vmem>>, vector<1x1xf32>
      tpu.vector_store %arg5[%c0_40, %c0_41], %68 {strides = array<i32>} : memref<1x1xf32, #tpu.memory_space<vmem>>, vector<1x1xf32>,
    } else {
    }
    return
  }
  func.func @transform_0(%arg0: i32, %arg1: i32) -> (i32, i32) {
    %c1_i32 = arith.constant 1 : i32
    %0 = arith.muli %arg0, %c1_i32 : i32
    %1 = arith.addi %0, %arg1 : i32
    %c0_i32 = arith.constant 0 : i32
    %2 = arith.minsi %1, %c0_i32 : i32
    %c0_i32_0 = arith.constant 0 : i32
    %c0_i32_1 = arith.constant 0 : i32
    return %2, %c0_i32_0 : i32, i32
  }
  func.func @transform_1(%arg0: i32, %arg1: i32) -> (i32, i32) {
    %c0_i32 = arith.constant 0 : i32
    %c0_i32_0 = arith.constant 0 : i32
    %c0_i32_1 = arith.constant 0 : i32
    return %c0_i32, %c0_i32_0 : i32, i32
  }
  func.func @transform_2(%arg0: i32, %arg1: i32) -> (i32, i32) {
    %c1_i32 = arith.constant 1 : i32
    %0 = arith.muli %arg0, %c1_i32 : i32
    %1 = arith.addi %0, %arg1 : i32
    %c0_i32 = arith.constant 0 : i32
    %2 = arith.minsi %1, %c0_i32 : i32
    %c0_i32_0 = arith.constant 0 : i32
    %c0_i32_1 = arith.constant 0 : i32
    return %2, %c0_i32_0 : i32, i32
  }
  func.func @transform_3(%arg0: i32, %arg1: i32) -> (i32, i32) {
    %c0_i32 = arith.constant 0 : i32
    %c0_i32_0 = arith.constant 0 : i32
    return %arg0, %c0_i32 : i32, i32
  }
}

</mosaic_0001>

<bundles_post_ra>
// kernel: tpu_custom_call.1
= control target key start
LH: loop header
LB: loop body
LE: loop exit
PB: predicated region body
PF: predicated region fallthrough
CT: control target
= control target key end

     0   :  { %8 = vsyncpa [#allocation6], 0  ;;  %s602_s0 = inlined_call_operand.hbm [shape: f32[8,32], index: 0, kind: input, shape index: {}]   ;;  %s603_s1 = inlined_call_operand.vmem [shape: f32[4,32], index: 1, kind: input, shape index: {}]   ;;  %s604_s2 = inlined_call_operand.vmem [shape: s8[8,4], index: 2, kind: input, shape index: {}]   ;;  %s605_s3 = inlined_call_operand.hbm [shape: f32[1,1], index: 3, kind: output, shape index: {}]  }
   0x1   :  { %9 = vsyncpa [#allocation7], 0  ;;  %s533_s12 = smov [#allocation5]   ;;  %s485_s16 = scalar_lea.hbm %s602_s0, 128 }
   0x2   :  { %s21_s13 = sshll.u32 %s533_s12, 4  ;;  %p486_p0 = scmp.ne.s32.totalorder %s602_s0, %s485_s16  ;;  %s22_s13 = int_to_ptr.vmem [resolvable:$true] %s21_s13 }
   0x3   :  { %p489_p1 = scmp.lt.u32.totalorder %s485_s16, %s602_s0 }
   0x5   :  { %p491_p2 = pnand %p489_p1, %p486_p0 }
   0x7   :  { %494 = shalt.err (!%p491_p2)
}
   0x8   :  { %s495_s21 = scalar_lea.vmem %s22_s13, 128  ;;  %p500_p4 = scmp.lt.s32.totalorder %s22_s13, %s22_s13 }
   0x9   :  { %p496_p3 = scmp.ne.s32.totalorder %s22_s13, %s495_s21  ;;  %p501_p5 = scmp.lt.s32.totalorder %s495_s21, %s495_s21 }
   0xb   :  { %p502_p6 = por %p501_p5, %p500_p4 }
   0xd   :  { %p503_p7 = pnand %p502_p6, %p496_p3 }
   0xf   :  { %506 = shalt.err (!%p503_p7)
}
  0x10   :  { %24 = dma.hbm_to_vmem [thread:$0]  %s602_s0, 128, %s22_s13, [#allocation6]  }
  0x11   :  { %529 = dma.done.wait [#allocation6], 128  }
  0x12   :  { %530 = vsyncadd [#allocation6], 4294967168  ;;  %vm69_vm0 = vcmask 24576   ;;  %v534_v0 = vmov 0.0   ;;  %vm535_vm1 = vmmov 0   ;;  %vm260_vm2 = vcmask 31744  }
  0x13   :  { %70 = vst.msk [vmem:[#allocation4] sm:$0x1] %vm69_vm0, %v534_v0  ;;  %458 = vmatprep.subr.mxu0 %v534_v0  ;;  %463 = vmatprep.subr.mxu1 %v534_v0  ;;  %v72_v1 = vld [vmem:[%s604_s2] sm:$0x3]  ;;  %v71_v3 = vld [vmem:[#allocation5] sm:$0xff]  ;;  %vm66_vm3 = vcmask 257024  }
  0x14   :  { %460 = vmatprep.mubr.msk.f32.mxu0 %vm535_vm1, %v534_v0  ;;  %465 = vmatprep.mubr.msk.f32.mxu1 %vm535_vm1, %v534_v0  ;;  %v73_v2 = vunpack.c.0.s8 %v72_v1  ;;  %v75_v5 = vmul.f32 %v71_v3, %v71_v3  ;;  %67 = vst.msk [vmem:[#allocation2] sm:$0xf] %vm66_vm3, %v534_v0  ;;  %68 = vst.msk [vmem:[#allocation3] sm:$0xf] %vm66_vm3, %v534_v0  ;;  %v274_v15 = vld [vmem:[%s603_s1] sm:$0xf] }
  0x15   :  { %459 = vmatpush3.msra.mxu0 %v71_v3  ;;  %v275_v16 = vmul.f32 %v274_v15, %v274_v15  ;;  %vm109_vm4 = vcmask 64512   ;;  %vm392_vm5 = vcmask 3072   ;;  %vm295_vm6 = vcmask 1043456   ;;  %s536_s29 = smov [#allocation8]  }
  0x16   :  { %v74_v4 = vcvt.s32.f32 %v73_v2  ;;  %468 = vmatprep.subr.mxu0 %v534_v0  ;;  %464 = vmatpush3.msra.mxu1 %v75_v5  ;;  %v385_v22 = vsel %vm66_vm3, %v274_v15, 0.0  ;;  %vm406_vm7 = vcmask 253952   ;;  %s431_s30 = sshll.u32 %s536_s29, 4  ;;  %vm423_vm8 = vcmask 0   ;;  %s432_s30 = int_to_ptr.vmem [resolvable:$true] %s431_s30 }
  0x17   :  { %v276_v17 = vsel %vm66_vm3, %v275_v16, 0.0  ;;  %v386_v23 = vrot.slane %v385_v22, 4  ;;  %s507_s4 = scalar_lea.vmem %s432_s30, 16  ;;  %s511_s5 = scalar_lea.vmem %s432_s30, 32 }
  0x18   :  { %77 = vxpose.xlu0.b32.start.end [1/1] (short) (narrow) %v74_v4, 8  ;;  %v261_v6 = vsel %vm260_vm2, %v74_v4, 0.0  ;;  %p508_p8 = scmp.ne.s32.totalorder %s432_s30, %s507_s4  ;;  %p512_p9 = scmp.lt.s32.totalorder %s432_s30, %s432_s30 }
  0x19   :  { %v262_v7 = vrot.slane %v261_v6, 4  ;;  %v387_v24 = vadd.f32 %v386_v23, %v385_v22  ;;  %p513_p10 = scmp.lt.s32.totalorder %s511_s5, %s507_s4 }
  0x1a   :  { %v259_v12 = vld [vmem:[#allocation4] sm:$0x1] }
  0x1b   :  { %v263_v8 = vadd.f32 %v262_v7, %v261_v6  ;;  %v388_v25 = vrot.slane %v387_v24, 2  ;;  %v76_v26 = vld [vmem:[#allocation2] sm:$0xf]  ;;  %v186_v27 = vld [vmem:[#allocation3] sm:$0xf]  ;;  %p514_p11 = por %p513_p10, %p512_p9 }
  0x1d   :  { %v264_v9 = vrot.slane %v263_v8, 2  ;;  %v389_v34 = vadd.f32 %v388_v25, %v387_v24  ;;  %p515_p12 = pnand %p514_p11, %p508_p8 }
  0x1f   :  { %v265_v10 = vadd.f32 %v264_v9, %v263_v8  ;;  %v390_v35 = vrot.slane %v389_v34, 1 }
  0x21   :  { %v266_v11 = vrot.slane %v265_v10, 1  ;;  %v391_v36 = vadd.f32 %v390_v35, %v389_v34 }
  0x23   :  { %v267_v13 = vadd.f32 %v266_v11, %v265_v10  ;;  %v405_v41 = vmul.f32 %v391_v36, %v391_v36 }
  0x25   :  { %v268_v14 = vadd.f32 %v267_v13, %v259_v12  ;;  %v407_v43 = vsel %vm406_vm7, %v405_v41, 0.0 }
  0x27   :  { %270 = vst.msk [vmem:[#allocation4] sm:$0x1] %vm69_vm0, %v268_v14 }
  0x2e   :  { %v291_v21 = vld [vmem:[#allocation4] sm:$0x1] }
  0x45   :  { %277 = vadd.xlane.f32.xlu0 %v276_v17 }
  0x98   :  { %v93_v18 = vpop.trf.xlu0 }
  0x99   :  { %461 = vmatmul.mubr.msk.f32.vlgmr.msra.gmra.mrb[0].mxu0 %vm109_vm4, %v93_v18  ;;  %466 = vmatmul.mubr.msk.f32.vlgmr.msra.gmra.mrb[0].mxu1 %vm109_vm4, %v93_v18 }
  0x9a   :  { %470 = vmatprep.mubr.msk.f32.mxu0 %vm535_vm1, %v534_v0 }
  0xd2   :  { %v278_v19 = vpop.xlane.xlu0 %277 }
  0xd3   :  { %v393_v20 = vsel %vm392_vm5, %v278_v19, 0.0  ;;  %469 = vmatpush3.msk.msra.mxu0 %vm295_vm6, %v278_v19 }
  0xd4   :  { %394 = vadd.xlane.f32.xlu1 %v393_v20  ;;  %471 = vmatmul.mubr.msk.f32.vlgmr.msra.gmra.mrb[2].mxu0 %vm260_vm2, %v291_v21 }
 0x161   :  { %v395_v46 = vpop.xlane.xlu1 %394 }
 0x162   :  { %v396_v47 = vrot.slane %v395_v46, 4 }
 0x164   :  { %v397_v48 = vadd.f32 %v396_v47, %v395_v46 }
 0x166   :  { %v398_v52 = vrot.slane %v397_v48, 2 }
 0x168   :  { %v399_v59 = vadd.f32 %v398_v52, %v397_v48 }
 0x16a   :  { %v400_v2 = vrot.slane %v399_v59, 1 }
 0x16c   :  { %v179_v28 = vpop.f32.mrb[0].mxu0  ;;  %v253_v29 = vpop.f32.mrb[0].mxu1  ;;  %v401_v7 = vadd.f32 %v400_v2, %v399_v59 }
 0x16d   :  { %v183_v30 = vadd.f32 %v179_v28, %v76_v26  ;;  %v257_v31 = vadd.f32 %v253_v29, %v186_v27  ;;  %v462_v32 = vpop.f32.mrb[1].mxu0  ;;  %v467_v33 = vpop.f32.mrb[1].mxu1 }
 0x16f   :  { %185 = vst.msk [vmem:[#allocation2] sm:$0xf] %vm66_vm3, %v183_v30  ;;  %258 = vst.msk [vmem:[#allocation3] sm:$0xf] %vm66_vm3, %v257_v31 }
 0x176   :  { %v279_v37 = vld [vmem:[#allocation3] sm:$0xf]  ;;  %v369_v38 = vld [vmem:[#allocation2] sm:$0xf] }
 0x177   :  { %v280_v39 = vsel %vm66_vm3, %v279_v37, 0.0  ;;  %v370_v40 = vmul.f32 %v369_v38, %v274_v15 }
 0x178   :  { %281 = vadd.xlane.f32.xlu1 %v280_v39 }
 0x179   :  { %v371_v42 = vsel %vm66_vm3, %v370_v40, 0.0 }
 0x17c   :  { %372 = vadd.xlane.f32.xlu1 %v371_v42 }
 0x180   :  { %408 = vadd.xlane.f32.xlu1 %v407_v43 }
 0x1a7   :  { %v365_v44 = vpop.f32.mrb[2].mxu0 }
 0x1a8   :  { %v472_v45 = vpop.f32.mrb[3].mxu0 }
 0x205   :  { %v282_v49 = vpop.xlane.xlu1 %281 }
 0x206   :  { %v283_v50 = vrot.slane %v282_v49, 4 }
 0x208   :  { %v284_v51 = vadd.f32 %v283_v50, %v282_v49 }
 0x209   :  { %v373_v53 = vpop.xlane.xlu1 %372 }
 0x20a   :  { %v285_v54 = vrot.slane %v284_v51, 2  ;;  %v374_v55 = vrot.slane %v373_v53, 4 }
 0x20c   :  { %v375_v56 = vadd.f32 %v374_v55, %v373_v53  ;;  %v286_v57 = vadd.f32 %v285_v54, %v284_v51 }
 0x20d   :  { %v409_v58 = vpop.xlane.xlu1 %408 }
 0x20e   :  { %v376_v60 = vrot.slane %v375_v56, 2  ;;  %v410_v61 = vrot.slane %v409_v58, 4  ;;  %v287_v62 = vrot.slane %v286_v57, 1 }
 0x210   :  { %v411_v63 = vadd.f32 %v410_v61, %v409_v58  ;;  %v288_v0 = vadd.f32 %v287_v62, %v286_v57  ;;  %v377_v1 = vadd.f32 %v376_v60, %v375_v56 }
 0x212   :  { %v412_v3 = vrot.slane %v411_v63, 2  ;;  %473 = vpush %v288_v0  ;;  %v378_v4 = vrot.slane %v377_v1, 1 }
 0x214   :  { %v413_v5 = vadd.f32 %v412_v3, %v411_v63  ;;  %v379_v6 = vadd.f32 %v378_v4, %v377_v1 }
 0x216   :  { %475 = vpush %v379_v6  ;;  %v414_v8 = vrot.slane %v413_v5, 1 }
 0x217   :  { %477 = vpush %v401_v7 }
 0x218   :  { %v415_v9 = vadd.f32 %v414_v8, %v413_v5 }
 0x21a   :  { %479 = vpush %v415_v9 }
 0x243   :  { %s474_s1 = spop %473 }
 0x244   :  { %v290_v10 = vstv %s474_s1 }
 0x245   :  { %v382_v14 = vadd.f32 %v365_v44, %v290_v10 }
 0x247   :  { %s476_s26 = spop %475 }
 0x248   :  { %v381_v11 = vstv %s476_s26  ;;  %s478_s27 = spop %477 }
 0x249   :  { %v383_v12 = vmul.f32 2.0, %v381_v11  ;;  %v403_v13 = vstv %s478_s27 }
 0x24a   :  { %v404_v17 = vmul.f32 8.0, %v403_v13 }
 0x24b   :  { %s480_s28 = spop %479  ;;  %v384_v16 = vsub.f32 %v382_v14, %v383_v12 }
 0x24c   :  { %v417_v15 = vstv %s480_s28 }
 0x24d   :  { %v418_v18 = vmul.f32 2.0, %v417_v15  ;;  %v420_v20 = vmul.f32 0.03125, %v384_v16 }
 0x24f   :  { %v419_v19 = vsub.f32 %v404_v17, %v418_v18 }
 0x251   :  { %v421_v21 = vmul.f32 0.0625, %v419_v19 }
 0x253   :  { %v422_v22 = vsub.f32 %v420_v20, %v421_v21 }
 0x255   :  { %424 = vst.msk [vmem:[#allocation8] sm:$0x1] %vm423_vm8, %v422_v22 }
 0x256   :  { %518 = shalt.err (!%p515_p12)
}
 0x257   :  { %s519_s8 = scalar_lea.hbm %s605_s3, 16 }
 0x258   :  { %p520_p13 = scmp.ne.s32.totalorder %s605_s3, %s519_s8  ;;  %p523_p0 = scmp.lt.u32.totalorder %s519_s8, %s605_s3 }
 0x25a   :  { %p525_p1 = pnand %p523_p0, %p520_p13 }
 0x25c   :  { %528 = shalt.err (!%p525_p1)
}
 0x25d   :  { %434 = dma.vmem_to_hbm [thread:$0]  %s432_s30, 16, %s605_s3, [#allocation7]  }
 0x25e   :  { %531 = dma.done.wait [#allocation7], 16  }
 0x25f   :  { %532 = vsyncadd [#allocation7], 4294967280 }
 0x260   :  { %438 = vsyncpa [#allocation6], 1 }
 0x261   :  { %439 = vsyncpa [#allocation7], 1 }

</bundles_post_ra>
